<compile_context>
chip_gen: v5e
topology: v5e:2x2
jax: 0.10.0
libtpu: 0.0.40
codegen_flags: <defaults>
</compile_context>

<pallas_src>
import jax
import jax.numpy as jnp
from jax import lax
from jax.experimental import pallas as pl
from jax.experimental.pallas import tpu as pltpu


def _round_up(x: int, m: int) -> int:
    return ((x + m - 1) // m) * m


def _vmem_budget_bytes() -> int:
    """Per-kernel VMEM budget derived from the device (leaves ~25% headroom)."""
    try:
        info = pltpu.get_tpu_info()
        cap = int(getattr(info, "vmem_capacity_bytes", 64 * 1024 * 1024))
    except Exception:
        cap = 64 * 1024 * 1024
    return (cap * 3) // 4


# ----------------------------------------------------------------------------
# MLP arch: whole Linear+ReLU chain in a single Pallas kernel, batch-tiled grid
# ----------------------------------------------------------------------------
def _make_mlp_kernel(num_layers: int):
    def kernel(*refs):
        x_ref = refs[0]
        out_ref = refs[-1]
        p = refs[1:-1]                    # w0, b0, w1, b1, ... (already (in, out), padded)
        h = x_ref[...]
        for i in range(num_layers):
            w = p[2 * i][...]             # (in_p, out_p)
            b = p[2 * i + 1][...]         # (1, out_p)
            h = jnp.dot(h, w, preferred_element_type=jnp.float32) + b
            h = jnp.maximum(h, 0.0)       # activation='relu', actfun_output=True
        out_ref[...] = h
    return kernel


def prepare_mlp_params(params):
    """One-time (init-time) prep: transpose to (in, out) and zero-pad every width to a
    multiple of 128 so all loads/stores are lane-dense.  Zero padding is exact: padded
    weight rows/cols and bias lanes are 0, and ReLU(0)=0, so padded lanes stay 0."""
    prepared = []
    for (w, b) in params:
        d_out, d_in = w.shape
        ip, op = _round_up(d_in, 128), _round_up(d_out, 128)
        wt = jnp.zeros((ip, op), jnp.float32).at[:d_in, :d_out].set(jnp.transpose(w))
        bp = jnp.zeros((1, op), jnp.float32).at[:, :d_out].set(b)
        prepared.append((wt, bp))
    weight_bytes = sum(w.size * 4 + b.size * 4 for (w, b) in prepared)
    return {"layers": prepared,
            "d_in": params[0][0].shape[1],
            "d_out": params[-1][0].shape[0],
            "weight_bytes": weight_bytes}


def mlp_feature_extractor(x2d, prep, *, tile_n=512):
    """x2d: (n, dim_x*dim_t) float32.  prep: output of prepare_mlp_params."""
    n, d_in = x2d.shape
    layers = prep["layers"]
    num_layers = len(layers)
    d_in_p = layers[0][0].shape[0]
    d_out_p = layers[-1][0].shape[1]
    d_out = prep["d_out"]

    budget = _vmem_budget_bytes()
    # Batch tile: multiple of 8 sublanes, shrunk until the double-buffered tiles plus
    # resident weights fit the device VMEM budget (v7x has half the VMEM of v5e/v6e).
    tile_n = max(8, _round_up(min(tile_n, n), 8))
    widest = max(max(w.shape[1] for (w, _) in layers), d_in_p)

    def footprint(tn):
        return (prep["weight_bytes"]
                + 2 * tn * d_in_p * 4      # double-buffered input tile
                + 2 * tn * d_out_p * 4     # double-buffered output tile
                + 2 * tn * widest * 4)     # live activations inside the chain

    while tile_n > 8 and footprint(tile_n) > budget:
        tile_n = max(8, _round_up(tile_n // 2, 8))

    # Ragged batches: pad to a tile multiple (keeps pipelining + megacore sharding).
    n_pad = _round_up(n, tile_n)
    x_p = jnp.zeros((n_pad, d_in_p), jnp.float32).at[:n, :d_in].set(x2d)

    flat = [x_p]
    in_specs = [pl.BlockSpec((tile_n, d_in_p), lambda i: (i, 0))]
    for (w, b) in layers:
        flat += [w, b]
        in_specs += [pl.BlockSpec(w.shape, lambda i: (0, 0)),   # weights stay resident
                     pl.BlockSpec(b.shape, lambda i: (0, 0))]

    out = pl.pallas_call(
        _make_mlp_kernel(num_layers),
        out_shape=jax.ShapeDtypeStruct((n_pad, d_out_p), jnp.float32),
        grid=(n_pad // tile_n,),
        in_specs=in_specs,
        out_specs=pl.BlockSpec((tile_n, d_out_p), lambda i: (i, 0)),
        compiler_params=pltpu.CompilerParams(
            dimension_semantics=("parallel",),      # batch axis -> both TCs on v7x
            vmem_limit_bytes=budget),
    )(*flat)
    return out[:n, :d_out]


# ----------------------------------------------------------------------------
# RNN arch: stacked GRU fused into one Pallas kernel, batch-tiled grid
# ----------------------------------------------------------------------------
def _make_gru_kernel(num_layers: int, T: int, tn: int, d_in_p: int, Hp: int, unroll):
    def kernel(*refs):
        x_ref = refs[0]                              # (T, tn, d_in_p)
        n_p = 4 * num_layers
        p = refs[1:1 + n_p]                          # wih, whh, bi, bhn per layer
        out_ref = refs[1 + n_p]                      # (tn, Hp)
        gi_sc = refs[2 + n_p]                        # (T*tn, 3*Hp) VMEM scratch
        seq_sc = refs[3 + n_p] if num_layers > 1 else None   # (T*tn, Hp)

        h = None
        for l in range(num_layers):
            wih = p[4 * l][...]                      # (d_in_l_p, 3*Hp)
            whh = p[4 * l + 1][...]                  # (Hp, 3*Hp) packed recurrent weight
            bi = p[4 * l + 2][...]                   # (1, 3*Hp)  (b_ih + [b_hr, b_hz, 0])
            bhn = p[4 * l + 3][...]                  # (1, Hp)

            if l == 0:
                xin = x_ref[...].reshape(T * tn, d_in_p)
            else:
                xin = seq_sc[...]                    # previous layer's outputs, on-chip

            # Hoisted input projection: ONE matmul over all timesteps, kept in VMEM
            # scratch and sliced per step (bounds live ranges / avoids spills).
            gi_sc[...] = jnp.dot(xin, wih, preferred_element_type=jnp.float32) + bi

            last = (l + 1 == num_layers)
            # Hoist the (1,Hp)->(tn,Hp) broadcast out of the recurrence (not CSE'd).
            bhn_b = jnp.broadcast_to(bhn, (tn, Hp))

            def step(t, h, whh=whh, bhn_b=bhn_b, last=last):
                row = pl.multiple_of(t * tn, tn)
                gi = gi_sc[pl.ds(row, tn), :]                         # (tn, 3*Hp)
                # Single packed recurrent matmul per step (gates 128-lane aligned).
                gh = jnp.dot(h, whh, preferred_element_type=jnp.float32)
                r = jax.nn.sigmoid(gi[:, 0:Hp] + gh[:, 0:Hp])
                z = jax.nn.sigmoid(gi[:, Hp:2 * Hp] + gh[:, Hp:2 * Hp])
                ng = jnp.tanh(gi[:, 2 * Hp:3 * Hp] + r * (gh[:, 2 * Hp:3 * Hp] + bhn_b))
                h_new = (1.0 - z) * ng + z * h
                if not last:
                    seq_sc[pl.ds(row, tn), :] = h_new                 # stays on-chip
                return h_new

            h = lax.fori_loop(0, T, step, jnp.zeros((tn, Hp), jnp.float32),
                              unroll=unroll)

        out_ref[...] = h        # only the final top-layer hidden state is emitted
    return kernel


def prepare_gru_params(gru_params):
    """One-time (init-time) prep: split packed (r, z, n) gates, transpose to (in, H),
    zero-pad H -> multiple of 128, repack into lane-aligned (in_p, 3*Hp) weights, and
    fold b_hr/b_hz into the hoisted input bias (b_hn must stay separate: PyTorch puts
    it inside r*(h@W_hn + b_hn))."""
    H = gru_params[0][1].shape[1]
    Hp = _round_up(H, 128)
    layers = []
    for li, (wih, whh, bih, bhh) in enumerate(gru_params):
        d_in = wih.shape[1]
        d_in_p = _round_up(d_in, 128) if li == 0 else Hp
        wih_p = jnp.zeros((d_in_p, 3 * Hp), jnp.float32)
        whh_p = jnp.zeros((Hp, 3 * Hp), jnp.float32)
        bi_p = jnp.zeros((1, 3 * Hp), jnp.float32)
        for g in range(3):
            wih_p = wih_p.at[:d_in, g * Hp:g * Hp + H].set(
                jnp.transpose(wih[g * H:(g + 1) * H]))
            whh_p = whh_p.at[:H, g * Hp:g * Hp + H].set(
                jnp.transpose(whh[g * H:(g + 1) * H]))
            bi_p = bi_p.at[:, g * Hp:g * Hp + H].set(bih[:, g * H:(g + 1) * H])
        bi_p = bi_p.at[:, 0 * Hp:0 * Hp + H].add(bhh[:, 0 * H:1 * H])   # + b_hr
        bi_p = bi_p.at[:, 1 * Hp:1 * Hp + H].add(bhh[:, 1 * H:2 * H])   # + b_hz
        bhn_p = jnp.zeros((1, Hp), jnp.float32).at[:, :H].set(bhh[:, 2 * H:3 * H])
        layers.append((wih_p, whh_p, bi_p, bhn_p))
    weight_bytes = sum(sum(a.size for a in lay) * 4 for lay in layers)
    return {"layers": layers, "H": H, "Hp": Hp,
            "d_in": gru_params[0][0].shape[1],
            "d_in_p": layers[0][0].shape[0],
            "weight_bytes": weight_bytes}


def rnn_feature_extractor(x_tm, prep, *, tile_n=256):
    """x_tm: (dim_t, n, dim_x) time-major float32.  prep: output of prepare_gru_params."""
    T, n, dim_x = x_tm.shape
    H, Hp = prep["H"], prep["Hp"]
    d_in_p = prep["d_in_p"]
    layers = prep["layers"]
    num_layers = len(layers)

    budget = _vmem_budget_bytes()
    tile_n = max(8, _round_up(min(tile_n, n), 8))    # >= 8 sublane rows

    def footprint(tn):
        return (prep["weight_bytes"]
                + 2 * T * tn * d_in_p * 4                       # double-buffered x tile
                + 2 * tn * Hp * 4                               # double-buffered out tile
                + T * tn * 3 * Hp * 4                           # gi scratch
                + (T * tn * Hp * 4 if num_layers > 1 else 0)    # seq scratch
                + 8 * tn * Hp * 4)                              # live gate values

    while tile_n > 8 and footprint(tile_n) > budget:
        tile_n = max(8, _round_up(tile_n // 2, 8))

    n_pad = _round_up(n, tile_n)
    x_p = jnp.zeros((T, n_pad, d_in_p), jnp.float32).at[:, :n, :dim_x].set(x_tm)

    flat = [x_p]
    in_specs = [pl.BlockSpec((T, tile_n, d_in_p), lambda i: (0, i, 0))]
    for (wih, whh, bi, bhn) in layers:
        flat += [wih, whh, bi, bhn]
        in_specs += [pl.BlockSpec(wih.shape, lambda i: (0, 0)),  # weights resident
                     pl.BlockSpec(whh.shape, lambda i: (0, 0)),
                     pl.BlockSpec(bi.shape, lambda i: (0, 0)),
                     pl.BlockSpec(bhn.shape, lambda i: (0, 0))]

    scratch = [pltpu.VMEM((T * tile_n, 3 * Hp), jnp.float32)]    # hoisted gi
    if num_layers > 1:
        scratch.append(pltpu.VMEM((T * tile_n, Hp), jnp.float32))  # inter-layer seq

    unroll = True if T <= 32 else 4

    out = pl.pallas_call(
        _make_gru_kernel(num_layers, T, tile_n, d_in_p, Hp, unroll),
        out_shape=jax.ShapeDtypeStruct((n_pad, Hp), jnp.float32),
        grid=(n_pad // tile_n,),
        in_specs=in_specs,
        out_specs=pl.BlockSpec((tile_n, Hp), lambda i: (i, 0)),
        scratch_shapes=scratch,
        compiler_params=pltpu.CompilerParams(
            dimension_semantics=("parallel",),      # batch tiles independent; time stays
            vmem_limit_bytes=budget),               #  sequential inside the kernel body
    )(*flat)
    return out[:n, :H]


# ----------------------------------------------------------------------------
# FeatureExtractor wrapper (glue in plain JAX, matching the PyTorch forward)
# ----------------------------------------------------------------------------
def feature_extractor_forward(x, config, prepared_params):
    dim_x, dim_t = config["dim_x"], config["dim_t"]
    x_ = x.reshape(-1, dim_x, dim_t)
    n = x_.shape[0]
    if config["arch_feat"] == "mlp":
        return mlp_feature_extractor(x_.reshape(n, -1), prepared_params)
    elif config["arch_feat"] == "rnn":
        x_tm = jnp.transpose(x_, (2, 0, 1))   # (dim_t, n, dim_x): PyTorch GRU seq-first
        return rnn_feature_extractor(x_tm, prepared_params)
    raise ValueError("unknown feature type")


# ----------------------------------------------------------------------------
# Pure-JAX references (for correctness check)
# ----------------------------------------------------------------------------
def mlp_ref(x2d, params):
    h = x2d
    for (w, b) in params:
        h = jnp.maximum(h @ w.T + b, 0.0)
    return h


def gru_ref(x_tm, gru_params):
    h_seq = x_tm
    for (wih, whh, bih, bhh) in gru_params:
        H = whh.shape[1]
        n = x_tm.shape[1]

        def step(h, x_t, wih=wih, whh=whh, bih=bih, bhh=bhh, H=H):
            gi = x_t @ wih.T + bih[0]
            gh = h @ whh.T + bhh[0]
            r = jax.nn.sigmoid(gi[:, :H] + gh[:, :H])
            z = jax.nn.sigmoid(gi[:, H:2 * H] + gh[:, H:2 * H])
            nt = jnp.tanh(gi[:, 2 * H:] + r * gh[:, 2 * H:])
            h_new = (1.0 - z) * nt + z * h
            return h_new, h_new

        h0 = jnp.zeros((n, H), jnp.float32)
        _, h_seq = lax.scan(step, h0, h_seq)
    return h_seq[-1]


# ----------------------------------------------------------------------------
# Deterministic parameter construction (PyTorch conventions)
# ----------------------------------------------------------------------------
def make_mlp_params(key, dims):
    params = []
    for d_in, d_out in zip(dims[:-1], dims[1:]):
        key, kw, kb = jax.random.split(key, 3)
        w = 0.2 * jax.random.normal(kw, (d_out, d_in), jnp.float32)
        b = 0.1 * jax.random.normal(kb, (1, d_out), jnp.float32)
        params.append((w, b))
    return params


def make_gru_params(key, dim_in, hidden, num_layers):
    params = []
    d = dim_in
    for _ in range(num_layers):
        key, k1, k2, k3, k4 = jax.random.split(key, 5)
        wih = 0.2 * jax.random.normal(k1, (3 * hidden, d), jnp.float32)
        whh = 0.2 * jax.random.normal(k2, (3 * hidden, hidden), jnp.float32)
        bih = 0.1 * jax.random.normal(k3, (1, 3 * hidden), jnp.float32)
        bhh = 0.1 * jax.random.normal(k4, (1, 3 * hidden), jnp.float32)
        params.append((wih, whh, bih, bhh))
        d = hidden
    return params


if __name__ == "__main__":
    key = jax.random.PRNGKey(0)
    k_x, k_mlp, k_gru = jax.random.split(key, 3)

    batch, dim_x, dim_t = 2, 4, 16
    num_units_feat = 32
    x = jax.random.normal(k_x, (batch, dim_x, dim_t), jnp.float32)

    # --- arch_feat = 'mlp' ---------------------------------------------------
    cfg_mlp = dict(dim_x=dim_x, dim_t=dim_t, activation="relu",
                   arch_feat="mlp", num_units_feat=num_units_feat,
                   hidlayers_feat=[32])
    mlp_dims = [dim_x * dim_t] + cfg_mlp["hidlayers_feat"] + [num_units_feat]
    mlp_params = make_mlp_params(k_mlp, mlp_dims)
    mlp_prep = prepare_mlp_params(mlp_params)        # init-time, once

    feat_mlp = feature_extractor_forward(x, cfg_mlp, mlp_prep)
    feat_mlp = jax.block_until_ready(feat_mlp)
    ref_mlp = mlp_ref(x.reshape(batch, -1), mlp_params)
    assert feat_mlp.shape == (batch, num_units_feat)
    assert jnp.allclose(feat_mlp, ref_mlp, atol=1e-2, rtol=1e-2)

    # --- arch_feat = 'rnn' (GRU) ---------------------------------------------
    cfg_rnn = dict(dim_x=dim_x, dim_t=dim_t, activation="relu",
                   arch_feat="rnn", num_units_feat=num_units_feat,
                   num_rnns_feat=2)
    gru_params = make_gru_params(k_gru, dim_x, num_units_feat,
                                 cfg_rnn["num_rnns_feat"])
    gru_prep = prepare_gru_params(gru_params)        # init-time, once

    feat_rnn = feature_extractor_forward(x, cfg_rnn, gru_prep)
    feat_rnn = jax.block_until_ready(feat_rnn)
    ref_rnn = gru_ref(jnp.transpose(x, (2, 0, 1)), gru_params)
    assert feat_rnn.shape == (batch, num_units_feat)
    assert jnp.allclose(feat_rnn, ref_rnn, atol=1e-2, rtol=1e-2)

    print("KERNEL_OK")
</pallas_src>

<mosaic_0001>
module attributes {stable_mosaic.version = 11 : i64} {
  func.func @kernel(%arg0: i32, %arg1: memref<8x128xf32, #tpu.memory_space<vmem>>, %arg2: memref<128x128xf32, #tpu.memory_space<vmem>>, %arg3: memref<1x128xf32, #tpu.memory_space<vmem>>, %arg4: memref<128x128xf32, #tpu.memory_space<vmem>>, %arg5: memref<1x128xf32, #tpu.memory_space<vmem>>, %arg6: memref<8x128xf32, #tpu.memory_space<vmem>>) attributes {dimension_semantics = [#tpu.dimension_semantics<parallel>], iteration_bounds = array<i64: 1>, scalar_prefetch = 0 : i64, scratch_operands = 0 : i64, tpu.core_type = #tpu.core_type<tc>, window_params = [{transform_indices = @transform_0, window_bounds = array<i64: 8, 128>}, {pipeline_mode = #tpu.pipeline_mode<synchronous>, transform_indices = @transform_1, window_bounds = array<i64: 128, 128>}, {pipeline_mode = #tpu.pipeline_mode<synchronous>, transform_indices = @transform_2, window_bounds = array<i64: 1, 128>}, {pipeline_mode = #tpu.pipeline_mode<synchronous>, transform_indices = @transform_3, window_bounds = array<i64: 128, 128>}, {pipeline_mode = #tpu.pipeline_mode<synchronous>, transform_indices = @transform_4, window_bounds = array<i64: 1, 128>}, {transform_indices = @transform_5, window_bounds = array<i64: 8, 128>}]} {
    %c0 = arith.constant 0 : index
    %c0_0 = arith.constant 0 : index
    %0 = vector.load %arg1[%c0, %c0_0] : memref<8x128xf32, #tpu.memory_space<vmem>>, vector<8x128xf32>
    %c0_1 = arith.constant 0 : index
    %c0_2 = arith.constant 0 : index
    %1 = vector.load %arg2[%c0_1, %c0_2] : memref<128x128xf32, #tpu.memory_space<vmem>>, vector<128x128xf32>
    %c0_3 = arith.constant 0 : index
    %c0_4 = arith.constant 0 : index
    %2 = vector.load %arg3[%c0_3, %c0_4] : memref<1x128xf32, #tpu.memory_space<vmem>>, vector<1x128xf32>
    %cst = arith.constant dense<0.000000e+00> : vector<8x128xf32>
    %3 = tpu.matmul %0, %1, %cst {dimension_numbers = #tpu.dot_dimension_numbers<[1], [0], [0], [1], [0, 0, 1, 1], [], []>} : vector<8x128xf32>, vector<128x128xf32>, vector<8x128xf32> -> vector<8x128xf32>
    %4 = vector.broadcast %2 : vector<1x128xf32> to vector<8x128xf32>
    %5 = arith.addf %3, %4 : vector<8x128xf32>
    %cst_5 = arith.constant 0.000000e+00 : f32
    %6 = vector.broadcast %cst_5 : f32 to vector<8x128xf32>
    %7 = arith.maximumf %5, %6 : vector<8x128xf32>
    %c0_6 = arith.constant 0 : index
    %c0_7 = arith.constant 0 : index
    %8 = vector.load %arg4[%c0_6, %c0_7] : memref<128x128xf32, #tpu.memory_space<vmem>>, vector<128x128xf32>
    %c0_8 = arith.constant 0 : index
    %c0_9 = arith.constant 0 : index
    %9 = vector.load %arg5[%c0_8, %c0_9] : memref<1x128xf32, #tpu.memory_space<vmem>>, vector<1x128xf32>
    %cst_10 = arith.constant dense<0.000000e+00> : vector<8x128xf32>
    %10 = tpu.matmul %7, %8, %cst_10 {dimension_numbers = #tpu.dot_dimension_numbers<[1], [0], [0], [1], [0, 0, 1, 1], [], []>} : vector<8x128xf32>, vector<128x128xf32>, vector<8x128xf32> -> vector<8x128xf32>
    %11 = vector.broadcast %9 : vector<1x128xf32> to vector<8x128xf32>
    %12 = arith.addf %10, %11 : vector<8x128xf32>
    %cst_11 = arith.constant 0.000000e+00 : f32
    %13 = vector.broadcast %cst_11 : f32 to vector<8x128xf32>
    %14 = arith.maximumf %12, %13 : vector<8x128xf32>
    %c0_12 = arith.constant 0 : index
    %c0_13 = arith.constant 0 : index
    %15 = vector.load %arg6[%c0_12, %c0_13] : memref<8x128xf32, #tpu.memory_space<vmem>>, vector<8x128xf32>
    tpu.vector_store %arg6[%c0_12, %c0_13], %14 {strides = array<i32>} : memref<8x128xf32, #tpu.memory_space<vmem>>, vector<8x128xf32>,
    return
  }
  func.func @transform_0(%arg0: i32) -> (i32, i32) {
    %c0_i32 = arith.constant 0 : i32
    %c0_i32_0 = arith.constant 0 : i32
    return %arg0, %c0_i32 : i32, i32
  }
  func.func @transform_1(%arg0: i32) -> (i32, i32) {
    %c0_i32 = arith.constant 0 : i32
    %c0_i32_0 = arith.constant 0 : i32
    %c0_i32_1 = arith.constant 0 : i32
    return %c0_i32, %c0_i32_0 : i32, i32
  }
  func.func @transform_2(%arg0: i32) -> (i32, i32) {
    %c0_i32 = arith.constant 0 : i32
    %c0_i32_0 = arith.constant 0 : i32
    %c0_i32_1 = arith.constant 0 : i32
    return %c0_i32, %c0_i32_0 : i32, i32
  }
  func.func @transform_3(%arg0: i32) -> (i32, i32) {
    %c0_i32 = arith.constant 0 : i32
    %c0_i32_0 = arith.constant 0 : i32
    %c0_i32_1 = arith.constant 0 : i32
    return %c0_i32, %c0_i32_0 : i32, i32
  }
  func.func @transform_4(%arg0: i32) -> (i32, i32) {
    %c0_i32 = arith.constant 0 : i32
    %c0_i32_0 = arith.constant 0 : i32
    %c0_i32_1 = arith.constant 0 : i32
    return %c0_i32, %c0_i32_0 : i32, i32
  }
  func.func @transform_5(%arg0: i32) -> (i32, i32) {
    %c0_i32 = arith.constant 0 : i32
    %c0_i32_0 = arith.constant 0 : i32
    return %arg0, %c0_i32 : i32, i32
  }
}

</mosaic_0001>

<bundles_post_ra>
// kernel: tpu_custom_call.1
= control target key start
LH: loop header
LB: loop body
LE: loop exit
PB: predicated region body
PF: predicated region fallthrough
CT: control target
= control target key end

     0   :  { %10 = vsyncpa [#allocation3], 0  ;;  %s332_s0 = inlined_call_operand.hbm [shape: f32[8,128], index: 0, kind: input, shape index: {}]   ;;  %s333_s1 = inlined_call_operand.hbm [shape: f32[128,128], index: 1, kind: input, shape index: {}]   ;;  %s334_s2 = inlined_call_operand.vmem [shape: f32[1,128], index: 2, kind: input, shape index: {}]   ;;  %s335_s3 = inlined_call_operand.hbm [shape: f32[128,128], index: 3, kind: input, shape index: {}]   ;;  %s336_s4 = inlined_call_operand.vmem [shape: f32[1,128], index: 4, kind: input, shape index: {}]   ;;  %s337_s5 = inlined_call_operand.hbm [shape: f32[8,128], index: 5, kind: output, shape index: {}]  }
   0x1   :  { %11 = vsyncpa [#allocation6], 0  ;;  %s28_s20 = sshll.u32 %s333_s1, 4  ;;  %s29_s20 = int_to_ptr.hbm [resolvable:$true] %s28_s20 }
   0x2   :  { %12 = vsyncpa [#allocation4], 0  ;;  %s278_s21 = smov [#allocation5]   ;;  %s18_s25 = sshll.u32 %s332_s0, 4  ;;  %s19_s25 = int_to_ptr.hbm [resolvable:$true] %s18_s25 }
   0x3   :  { %s30_s22 = sshll.u32 %s278_s21, 4  ;;  %s279_s26 = smov 128   ;;  %s31_s22 = int_to_ptr.vmem [resolvable:$true] %s30_s22 }
   0x4   :  { %s280_s27 = smov 8   ;;  %s281_s28 = smov [#allocation2]  }
   0x5   :  { %36 = dma.hbm_to_vmem [thread:$0]  %s29_s20, 2048, %s31_s22, [#allocation6], %s279_s26, %s279_s26, %s280_s27  }
   0x6   :  { %s20_s29 = sshll.u32 %s281_s28, 4  ;;  %s43_s7 = sshll.u32 %s335_s3, 4  ;;  %s21_s29 = int_to_ptr.vmem [resolvable:$true] %s20_s29  ;;  %s44_s7 = int_to_ptr.hbm [resolvable:$true] %s43_s7 }
   0x7   :  { %23 = dma.hbm_to_vmem [thread:$0]  %s19_s25, 128, %s21_s29, [#allocation3]  }
   0x8   :  { %s282_s1 = smov [#allocation7]  }
   0x9   :  { %s45_s8 = sshll.u32 %s282_s1, 4  ;;  %s46_s8 = int_to_ptr.vmem [resolvable:$true] %s45_s8 }
   0xa   :  { %51 = dma.hbm_to_vmem [thread:$0]  %s44_s7, 2048, %s46_s8, [#allocation6], %s279_s26, %s279_s26, %s280_s27  }
   0xb   :  { %272 = dma.done.wait [#allocation3], 128  }
   0xc   :  { %273 = vsyncadd [#allocation3], 4294967168 }
   0xd   :  { %274 = dma.done.wait [#allocation6], 4096  }
   0xe   :  { %275 = vsyncadd [#allocation6], 4294963200  ;;  %v82_v0 = vld [vmem:[#allocation5 + $0x78] sm:$0xff]  ;;  %v81_v1 = vld [vmem:[#allocation5 + $0x70] sm:$0xff]  ;;  %s283_s11 = smov [#allocation8]   ;;  %s157_s15 = sshll.u32 %s337_s5, 4  ;;  %s158_s15 = int_to_ptr.hbm [resolvable:$true] %s157_s15 }
   0xf   :  { %87 = vmatpush.msra.mxu0 %v82_v0  ;;  %v80_v2 = vld [vmem:[#allocation5 + $0x68] sm:$0xff]  ;;  %v79_v3 = vld [vmem:[#allocation5 + $0x60] sm:$0xff]  ;;  %v123_v4 = vld [vmem:[#allocation7 + $0x78] sm:$0xff]  ;;  %s155_s12 = sshll.u32 %s283_s11, 4  ;;  %s156_s12 = int_to_ptr.vmem [resolvable:$true] %s155_s12 }
  0x10   :  { %v78_v5 = vld [vmem:[#allocation5 + $0x58] sm:$0xff]  ;;  %128 = vmatpush.msra.mxu1 %v123_v4  ;;  %v122_v6 = vld [vmem:[#allocation7 + $0x70] sm:$0xff]  ;;  %v121_v7 = vld [vmem:[#allocation7 + $0x68] sm:$0xff] }
  0x11   :  { %88 = vmatpush.msra.mxu0 %v81_v1  ;;  %v77_v8 = vld [vmem:[#allocation5 + $0x50] sm:$0xff]  ;;  %v120_v9 = vld [vmem:[#allocation7 + $0x60] sm:$0xff]  ;;  %v76_v10 = vld [vmem:[#allocation5 + $0x48] sm:$0xff] }
  0x12   :  { %129 = vmatpush.msra.mxu1 %v122_v6  ;;  %v119_v11 = vld [vmem:[#allocation7 + $0x58] sm:$0xff]  ;;  %v75_v12 = vld [vmem:[#allocation5 + $0x40] sm:$0xff]  ;;  %v118_v13 = vld [vmem:[#allocation7 + $0x50] sm:$0xff] }
  0x13   :  { %89 = vmatpush.msra.mxu0 %v80_v2  ;;  %v74_v14 = vld [vmem:[#allocation5 + $0x38] sm:$0xff]  ;;  %v117_v15 = vld [vmem:[#allocation7 + $0x48] sm:$0xff]  ;;  %v73_v16 = vld [vmem:[#allocation5 + $0x30] sm:$0xff] }
  0x14   :  { %130 = vmatpush.msra.mxu1 %v121_v7  ;;  %v116_v17 = vld [vmem:[#allocation7 + $0x40] sm:$0xff]  ;;  %v72_v18 = vld [vmem:[#allocation5 + $0x28] sm:$0xff]  ;;  %v115_v19 = vld [vmem:[#allocation7 + $0x38] sm:$0xff] }
  0x15   :  { %90 = vmatpush.msra.mxu0 %v79_v3  ;;  %v71_v20 = vld [vmem:[#allocation5 + $0x20] sm:$0xff]  ;;  %v114_v21 = vld [vmem:[#allocation7 + $0x30] sm:$0xff]  ;;  %v70_v22 = vld [vmem:[#allocation5 + $0x18] sm:$0xff] }
  0x16   :  { %131 = vmatpush.msra.mxu1 %v120_v9  ;;  %v113_v23 = vld [vmem:[#allocation7 + $0x28] sm:$0xff]  ;;  %v69_v24 = vld [vmem:[#allocation5 + $0x10] sm:$0xff]  ;;  %v112_v25 = vld [vmem:[#allocation7 + $0x20] sm:$0xff] }
  0x17   :  { %91 = vmatpush.msra.mxu0 %v78_v5  ;;  %v68_v26 = vld [vmem:[#allocation5 + $0x8] sm:$0xff]  ;;  %v111_v27 = vld [vmem:[#allocation7 + $0x18] sm:$0xff]  ;;  %v67_v28 = vld [vmem:[#allocation5] sm:$0xff] }
  0x18   :  { %132 = vmatpush.msra.mxu1 %v119_v11  ;;  %v66_v29 = vld [vmem:[#allocation2] sm:$0xff]  ;;  %v110_v30 = vld [vmem:[#allocation7 + $0x10] sm:$0xff]  ;;  %v109_v31 = vld [vmem:[#allocation7 + $0x8] sm:$0xff] }
  0x19   :  { %92 = vmatpush.msra.mxu0 %v77_v8  ;;  %v108_v32 = vld [vmem:[#allocation7] sm:$0xff]  ;;  %v174_v33 = vld [vmem:[%s334_s2] ss:$0 sm:$0xff] }
  0x1a   :  { %133 = vmatpush.msra.mxu1 %v118_v13  ;;  %v175_v37 = vld [vmem:[%s336_s4] ss:$0 sm:$0xff] }
  0x1b   :  { %93 = vmatpush.msra.mxu0 %v76_v10 }
  0x1c   :  { %134 = vmatpush.msra.mxu1 %v117_v15 }
  0x1d   :  { %94 = vmatpush.msra.mxu0 %v75_v12 }
  0x1e   :  { %135 = vmatpush.msra.mxu1 %v116_v17 }
  0x1f   :  { %95 = vmatpush.msra.mxu0 %v74_v14 }
  0x20   :  { %136 = vmatpush.msra.mxu1 %v115_v19 }
  0x21   :  { %96 = vmatpush.msra.mxu0 %v73_v16 }
  0x22   :  { %137 = vmatpush.msra.mxu1 %v114_v21 }
  0x23   :  { %97 = vmatpush.msra.mxu0 %v72_v18 }
  0x24   :  { %138 = vmatpush.msra.mxu1 %v113_v23 }
  0x25   :  { %98 = vmatpush.msra.mxu0 %v71_v20 }
  0x26   :  { %139 = vmatpush.msra.mxu1 %v112_v25 }
  0x27   :  { %99 = vmatpush.msra.mxu0 %v70_v22 }
  0x28   :  { %140 = vmatpush.msra.mxu1 %v111_v27 }
  0x29   :  { %100 = vmatpush.msra.mxu0 %v69_v24 }
  0x2a   :  { %141 = vmatpush.msra.mxu1 %v110_v30 }
  0x2b   :  { %101 = vmatpush.msra.mxu0 %v68_v26 }
  0x2c   :  { %142 = vmatpush.msra.mxu1 %v109_v31 }
  0x2d   :  { %102 = vmatpush.msra.mxu0 %v67_v28 }
  0x2e   :  { %103 = vmatmul.f32.vlgmr.msra.gmra.mxu0 %v66_v29  ;;  %143 = vmatpush.msra.mxu1 %v108_v32 }
  0xab   :  { %v104_v34 = vpop.f32.mrf.mxu0 }
  0xac   :  { %v105_v35 = vadd.f32 %v174_v33, %v104_v34 }
  0xae   :  { %v107_v36 = vmax.f32 %v105_v35, 0.0 }
  0xb0   :  { %144 = vmatmul.f32.vlgmr.msra.gmra.mxu1 %v107_v36 }
 0x12d   :  { %v145_v38 = vpop.f32.mrf.mxu1 }
 0x12e   :  { %v146_v39 = vadd.f32 %v175_v37, %v145_v38 }
 0x130   :  { %v148_v40 = vmax.f32 %v146_v39, 0.0 }
 0x132   :  { %149 = vst [vmem:[#allocation8] sm:$0xff] %v148_v40 }
 0x133   :  { %160 = dma.vmem_to_hbm [thread:$0]  %s156_s12, 128, %s158_s15, [#allocation4]  }
 0x134   :  { %276 = dma.done.wait [#allocation4], 128  }
 0x135   :  { %277 = vsyncadd [#allocation4], 4294967168 }
 0x136   :  { %165 = vsyncpa [#allocation3], 1 }
 0x137   :  { %166 = vsyncpa [#allocation6], 1 }
 0x138   :  { %167 = vsyncpa [#allocation4], 1 }

</bundles_post_ra>
